<compile_context>
chip_gen: v5e
topology: v5e:2x2
jax: 0.10.0
libtpu: 0.0.40
codegen_flags: <defaults>
</compile_context>

<pallas_src>
import functools

import jax
import jax.numpy as jnp
from jax.experimental import pallas as pl
from jax.experimental.pallas import tpu as pltpu

DIM = 32          # embedding dim
NUM_HEADS = 4
FF = 128          # dim_feedforward of TransformerEncoderLayer
EPS = 1e-5


def _layer_norm(v, w, b):
    mu = jnp.mean(v, axis=-1, keepdims=True)
    c = v - mu
    var = jnp.mean(c * c, axis=-1, keepdims=True)
    return c * jax.lax.rsqrt(var + EPS) * w + b


def selfatt_kernel(xu_ref, xi_ref, wqkv_ref, bqkv_ref, wo_ref, bo_ref,
                   ln1w_ref, ln1b_ref, w1_ref, b1_ref, w2_ref, b2_ref,
                   ln2w_ref, ln2b_ref, out_ref, *, mm_dtype):
    tb, s_u, d = xu_ref.shape
    s_i = xi_ref.shape[1]
    s = s_u + s_i
    hd = d // NUM_HEADS
    scale = 1.0 / float(hd) ** 0.5

    # Stitch user/item tokens along the sequence axis as a value (no scratch round trip).
    x3 = jnp.concatenate([xu_ref[...], xi_ref[...]], axis=1)        # (tb, s, d) f32
    x = x3.reshape(tb * s, d)                                       # (R, d) f32

    def mm(a, w):   # MXU matmul with f32 accumulation; weights already in mm_dtype
        return jnp.dot(a.astype(mm_dtype), w, preferred_element_type=jnp.float32)

    # ---- QKV projection on the flattened (tb*s, d) view ----
    qkv = mm(x, wqkv_ref[...]) + bqkv_ref[...]                      # (R, 3d) f32
    # Cast / reshape q,k,v ONCE (hoisted out of the head loop).
    q = (qkv[:, 0 * d:1 * d] * scale).reshape(tb, s, d).astype(mm_dtype)
    k = qkv[:, 1 * d:2 * d].reshape(tb, s, d).astype(mm_dtype)
    v = qkv[:, 2 * d:3 * d].reshape(tb, s, d).astype(mm_dtype)

    # ---- Multi-head attention, batched over tb (single batch dim per einsum) ----
    heads = []
    for h in range(NUM_HEADS):
        lo, hi = h * hd, (h + 1) * hd
        sc = jnp.einsum("bqd,bkd->bqk", q[:, :, lo:hi], k[:, :, lo:hi],
                        preferred_element_type=jnp.float32)         # (tb, s, s)
        sc = sc - jnp.max(sc, axis=-1, keepdims=True)
        p = jnp.exp(sc)
        p = p * pl.reciprocal(jnp.sum(p, axis=-1, keepdims=True), approx=True)
        heads.append(jnp.einsum("bqk,bkd->bqd", p.astype(mm_dtype), v[:, :, lo:hi],
                                preferred_element_type=jnp.float32))  # (tb, s, hd)

    # Single K=d output projection instead of four K=hd folded matmuls.
    attn = jnp.concatenate(heads, axis=-1).reshape(tb * s, d)       # (R, d) f32
    attn = mm(attn, wo_ref[...]) + bo_ref[...]

    # ---- Residual + LayerNorm 1 (post-norm) ----
    y = _layer_norm(x + attn, ln1w_ref[...], ln1b_ref[...])

    # ---- Feed-forward (ReLU) ----
    h1 = jnp.maximum(mm(y, w1_ref[...]) + b1_ref[...], 0.0)
    h2 = mm(h1, w2_ref[...]) + b2_ref[...]

    # ---- Residual + LayerNorm 2 ----
    out = _layer_norm(y + h2, ln2w_ref[...], ln2b_ref[...])
    out_ref[...] = out.reshape(tb, s, d)


def _cores_per_chip():
    """TPU generations with 2 TensorCores per chip (megacore)."""
    try:
        kind = jax.devices()[0].device_kind.lower()
    except Exception:
        return 1
    return 2 if any(tag in kind for tag in ("v7", "7x", "v4", "v5p")) else 1


def _pick_mm_dtype():
    """bf16 MXU operands on every TPU generation (v5e MXU takes bf16 with f32 acc)."""
    try:
        plat = jax.devices()[0].platform
    except Exception:
        return jnp.float32
    return jnp.bfloat16 if plat == "tpu" else jnp.float32


@functools.partial(jax.jit, static_argnames=("mm_dtype", "rows_per_step"))
def self_att_pallas(user_fea, item_fea, params, *, mm_dtype=jnp.bfloat16,
                    rows_per_step=1024):
    (wqkv, bqkv, wo, bo, ln1w, ln1b, w1, b1, w2, b2, ln2w, ln2b) = params

    user_fea = user_fea.astype(jnp.float32)
    item_fea = item_fea.astype(jnp.float32)
    B, S_u, D = user_fea.shape
    S_i = item_fea.shape[1]
    S = S_u + S_i

    # ---- Batch-tile selection ----
    # Target ~rows_per_step rows (tb*S) per grid step; collapse small batches into
    # one step, but guarantee >= 2 steps on 2-TensorCore chips so both cores work.
    tb = max(1, min(B, max(1, rows_per_step // S)))
    if _cores_per_chip() >= 2 and B > 1 and tb >= B:
        tb = -(-B // 2)                      # ceil(B/2) -> 2 grid steps
    B_pad = -(-B // tb) * tb
    if B_pad != B:
        pad = ((0, B_pad - B), (0, 0), (0, 0))
        user_fea = jnp.pad(user_fea, pad)
        item_fea = jnp.pad(item_fea, pad)
    grid = (B_pad // tb,)

    # Pre-transpose projection weights once; cast MXU operands to mm_dtype.
    wqkv_t = wqkv.T.astype(mm_dtype)   # (D, 3D)
    wo_t = wo.T.astype(mm_dtype)       # (D, D)
    w1_t = w1.T.astype(mm_dtype)       # (D, FF)
    w2_t = w2.T.astype(mm_dtype)       # (FF, D)

    def rep(a):   # full weight resident every step (constant block index -> no re-DMA)
        return pl.BlockSpec(a.shape, lambda b: (0,) * a.ndim)

    grid_spec = pltpu.PrefetchScalarGridSpec(
        num_scalar_prefetch=0,
        grid=grid,
        in_specs=[
            pl.BlockSpec((tb, S_u, D), lambda b: (b, 0, 0)),   # user tokens
            pl.BlockSpec((tb, S_i, D), lambda b: (b, 0, 0)),   # item tokens
            rep(wqkv_t), rep(bqkv),
            rep(wo_t), rep(bo),
            rep(ln1w), rep(ln1b),
            rep(w1_t), rep(b1),
            rep(w2_t), rep(b2),
            rep(ln2w), rep(ln2b),
        ],
        out_specs=pl.BlockSpec((tb, S, D), lambda b: (b, 0, 0)),
    )

    out = pl.pallas_call(
        functools.partial(selfatt_kernel, mm_dtype=mm_dtype),
        out_shape=jax.ShapeDtypeStruct((B_pad, S, D), jnp.float32),
        grid_spec=grid_spec,
        compiler_params=pltpu.CompilerParams(
            dimension_semantics=("parallel",),
            vmem_limit_bytes=32 * 1024 * 1024),
    )(user_fea, item_fea, wqkv_t, bqkv, wo_t, bo, ln1w, ln1b,
      w1_t, b1, w2_t, b2, ln2w, ln2b)

    return out[:B] if B_pad != B else out


def self_att_reference(user_fea, item_fea, params):
    """Pure-JAX f32 reference of the same forward pass (eval mode)."""
    (wqkv, bqkv, wo, bo, ln1w, ln1b, w1, b1, w2, b2, ln2w, ln2b) = params
    x = jnp.concatenate([user_fea, item_fea], axis=1).astype(jnp.float32)
    B, S, D = x.shape
    hd = D // NUM_HEADS

    qkv = x @ wqkv.T + bqkv[0]
    q, k, v = qkv[..., :D], qkv[..., D:2 * D], qkv[..., 2 * D:]

    def split_heads(t):  # (B, S, D) -> (B, H, S, hd)
        return t.reshape(B, S, NUM_HEADS, hd).transpose(0, 2, 1, 3)

    qh, kh, vh = split_heads(q), split_heads(k), split_heads(v)
    s = jnp.einsum("bhqd,bhkd->bhqk", qh, kh) / jnp.sqrt(hd)
    p = jax.nn.softmax(s, axis=-1)
    attn = jnp.einsum("bhqk,bhkd->bhqd", p, vh).transpose(0, 2, 1, 3).reshape(B, S, D)
    attn = attn @ wo.T + bo[0]

    def ln(v_, w_, b_):
        mu = jnp.mean(v_, axis=-1, keepdims=True)
        var = jnp.mean((v_ - mu) ** 2, axis=-1, keepdims=True)
        return (v_ - mu) / jnp.sqrt(var + EPS) * w_[0] + b_[0]

    y = ln(x + attn, ln1w, ln1b)
    h1 = jnp.maximum(y @ w1.T + b1[0], 0.0)
    h2 = h1 @ w2.T + b2[0]
    return ln(y + h2, ln2w, ln2b)


def init_params(key, dim=DIM, ff=FF):
    ks = jax.random.split(key, 8)
    scale = 0.05
    wqkv = scale * jax.random.normal(ks[0], (3 * dim, dim), jnp.float32)
    bqkv = scale * jax.random.normal(ks[1], (1, 3 * dim), jnp.float32)
    wo = scale * jax.random.normal(ks[2], (dim, dim), jnp.float32)
    bo = scale * jax.random.normal(ks[3], (1, dim), jnp.float32)
    ln1w = jnp.ones((1, dim), jnp.float32)
    ln1b = jnp.zeros((1, dim), jnp.float32)
    w1 = scale * jax.random.normal(ks[4], (ff, dim), jnp.float32)
    b1 = scale * jax.random.normal(ks[5], (1, ff), jnp.float32)
    w2 = scale * jax.random.normal(ks[6], (dim, ff), jnp.float32)
    b2 = scale * jax.random.normal(ks[7], (1, dim), jnp.float32)
    ln2w = jnp.ones((1, dim), jnp.float32)
    ln2b = jnp.zeros((1, dim), jnp.float32)
    return (wqkv, bqkv, wo, bo, ln1w, ln1b, w1, b1, w2, b2, ln2w, ln2b)


if __name__ == "__main__":
    key = jax.random.PRNGKey(0)
    k_u, k_i, k_p, k_u2, k_i2 = jax.random.split(key, 5)

    params = init_params(k_p)
    mm_dtype = _pick_mm_dtype()
    tol = 3e-2 if mm_dtype == jnp.bfloat16 else 2e-3

    # Small case matching the module spec: B=2, user/item seq 4 each, dim 32.
    B, S_u, S_i = 2, 4, 4
    user_fea = jax.random.normal(k_u, (B, S_u, DIM), jnp.float32)
    item_fea = jax.random.normal(k_i, (B, S_i, DIM), jnp.float32)

    out = jax.block_until_ready(
        self_att_pallas(user_fea, item_fea, params, mm_dtype=mm_dtype))
    ref = self_att_reference(user_fea, item_fea, params)
    assert out.shape == (B, S_u + S_i, DIM)
    assert bool(jnp.allclose(out, ref, rtol=tol, atol=tol)), "mismatch vs reference (small)"

    # Larger batch: exercises the batch-tiled grid (and 2-step split on 2-TC chips).
    B2 = 64
    user2 = jax.random.normal(k_u2, (B2, S_u, DIM), jnp.float32)
    item2 = jax.random.normal(k_i2, (B2, S_i, DIM), jnp.float32)
    out2 = jax.block_until_ready(
        self_att_pallas(user2, item2, params, mm_dtype=mm_dtype))
    ref2 = self_att_reference(user2, item2, params)
    assert bool(jnp.allclose(out2, ref2, rtol=tol, atol=tol)), "mismatch vs reference (large)"

    print("KERNEL_OK")
</pallas_src>

<mosaic_0001>
module attributes {stable_mosaic.version = 11 : i64} {
  func.func @selfatt_kernel(%arg0: i32, %arg1: memref<2x4x32xf32, #tpu.memory_space<vmem>>, %arg2: memref<2x4x32xf32, #tpu.memory_space<vmem>>, %arg3: memref<32x96xf32, #tpu.memory_space<vmem>>, %arg4: memref<1x96xf32, #tpu.memory_space<vmem>>, %arg5: memref<32x32xf32, #tpu.memory_space<vmem>>, %arg6: memref<1x32xf32, #tpu.memory_space<vmem>>, %arg7: memref<1x32xf32, #tpu.memory_space<vmem>>, %arg8: memref<1x32xf32, #tpu.memory_space<vmem>>, %arg9: memref<32x128xf32, #tpu.memory_space<vmem>>, %arg10: memref<1x128xf32, #tpu.memory_space<vmem>>, %arg11: memref<128x32xf32, #tpu.memory_space<vmem>>, %arg12: memref<1x32xf32, #tpu.memory_space<vmem>>, %arg13: memref<1x32xf32, #tpu.memory_space<vmem>>, %arg14: memref<1x32xf32, #tpu.memory_space<vmem>>, %arg15: memref<2x8x32xf32, #tpu.memory_space<vmem>>) attributes {dimension_semantics = [#tpu.dimension_semantics<parallel>], iteration_bounds = array<i64: 1>, scalar_prefetch = 0 : i64, scratch_operands = 0 : i64, tpu.core_type = #tpu.core_type<tc>, window_params = [{transform_indices = @transform_0, window_bounds = array<i64: 2, 4, 32>}, {transform_indices = @transform_1, window_bounds = array<i64: 2, 4, 32>}, {pipeline_mode = #tpu.pipeline_mode<synchronous>, transform_indices = @transform_2, window_bounds = array<i64: 32, 96>}, {pipeline_mode = #tpu.pipeline_mode<synchronous>, transform_indices = @transform_3, window_bounds = array<i64: 1, 96>}, {pipeline_mode = #tpu.pipeline_mode<synchronous>, transform_indices = @transform_4, window_bounds = array<i64: 32, 32>}, {pipeline_mode = #tpu.pipeline_mode<synchronous>, transform_indices = @transform_5, window_bounds = array<i64: 1, 32>}, {pipeline_mode = #tpu.pipeline_mode<synchronous>, transform_indices = @transform_6, window_bounds = array<i64: 1, 32>}, {pipeline_mode = #tpu.pipeline_mode<synchronous>, transform_indices = @transform_7, window_bounds = array<i64: 1, 32>}, {pipeline_mode = #tpu.pipeline_mode<synchronous>, transform_indices = @transform_8, window_bounds = array<i64: 32, 128>}, {pipeline_mode = #tpu.pipeline_mode<synchronous>, transform_indices = @transform_9, window_bounds = array<i64: 1, 128>}, {pipeline_mode = #tpu.pipeline_mode<synchronous>, transform_indices = @transform_10, window_bounds = array<i64: 128, 32>}, {pipeline_mode = #tpu.pipeline_mode<synchronous>, transform_indices = @transform_11, window_bounds = array<i64: 1, 32>}, {pipeline_mode = #tpu.pipeline_mode<synchronous>, transform_indices = @transform_12, window_bounds = array<i64: 1, 32>}, {pipeline_mode = #tpu.pipeline_mode<synchronous>, transform_indices = @transform_13, window_bounds = array<i64: 1, 32>}, {transform_indices = @transform_14, window_bounds = array<i64: 2, 8, 32>}]} {
    %c0 = arith.constant 0 : index
    %c0_0 = arith.constant 0 : index
    %c0_1 = arith.constant 0 : index
    %0 = vector.load %arg1[%c0, %c0_0, %c0_1] : memref<2x4x32xf32, #tpu.memory_space<vmem>>, vector<2x4x32xf32>
    %c0_2 = arith.constant 0 : index
    %c0_3 = arith.constant 0 : index
    %c0_4 = arith.constant 0 : index
    %1 = vector.load %arg2[%c0_2, %c0_3, %c0_4] : memref<2x4x32xf32, #tpu.memory_space<vmem>>, vector<2x4x32xf32>
    %2 = tpu.concatenate %0, %1 in 1 : vector<2x4x32xf32>, vector<2x4x32xf32> -> vector<2x8x32xf32>
    %3 = vector.shape_cast %2 : vector<2x8x32xf32> to vector<16x32xf32>
    %c0_5 = arith.constant 0 : index
    %c0_6 = arith.constant 0 : index
    %4 = vector.load %arg3[%c0_5, %c0_6] : memref<32x96xf32, #tpu.memory_space<vmem>>, vector<32x96xf32>
    %cst = arith.constant dense<0.000000e+00> : vector<16x96xf32>
    %5 = tpu.matmul %3, %4, %cst {dimension_numbers = #tpu.dot_dimension_numbers<[1], [0], [0], [1], [0, 0, 1, 1], [], []>} : vector<16x32xf32>, vector<32x96xf32>, vector<16x96xf32> -> vector<16x96xf32>
    %c0_7 = arith.constant 0 : index
    %c0_8 = arith.constant 0 : index
    %6 = vector.load %arg4[%c0_7, %c0_8] : memref<1x96xf32, #tpu.memory_space<vmem>>, vector<1x96xf32>
    %7 = vector.broadcast %6 : vector<1x96xf32> to vector<16x96xf32>
    %8 = arith.addf %5, %7 : vector<16x96xf32>
    %9 = vector.extract_strided_slice %8 {offsets = [0, 0], sizes = [16, 32], strides = [1, 1]} : vector<16x96xf32> to vector<16x32xf32>
    %cst_9 = arith.constant 0.353553385 : f32
    %10 = vector.broadcast %cst_9 : f32 to vector<16x32xf32>
    %11 = arith.mulf %9, %10 : vector<16x32xf32>
    %12 = vector.shape_cast %11 : vector<16x32xf32> to vector<2x8x32xf32>
    %13 = vector.extract_strided_slice %8 {offsets = [0, 32], sizes = [16, 32], strides = [1, 1]} : vector<16x96xf32> to vector<16x32xf32>
    %14 = vector.shape_cast %13 : vector<16x32xf32> to vector<2x8x32xf32>
    %15 = vector.extract_strided_slice %8 {offsets = [0, 64], sizes = [16, 32], strides = [1, 1]} : vector<16x96xf32> to vector<16x32xf32>
    %16 = vector.shape_cast %15 : vector<16x32xf32> to vector<2x8x32xf32>
    %17 = vector.extract_strided_slice %12 {offsets = [0, 0, 0], sizes = [2, 8, 8], strides = [1, 1, 1]} : vector<2x8x32xf32> to vector<2x8x8xf32>
    %18 = vector.extract_strided_slice %14 {offsets = [0, 0, 0], sizes = [2, 8, 8], strides = [1, 1, 1]} : vector<2x8x32xf32> to vector<2x8x8xf32>
    "tpu.trace_start"() <{level = 10 : i32, message = "bqd,bkd->bqk"}> : () -> ()
    %cst_10 = arith.constant dense<0.000000e+00> : vector<2x8x8xf32>
    %19 = tpu.matmul %17, %18, %cst_10 {dimension_numbers = #tpu.dot_dimension_numbers<[2], [2], [1], [1], [0, 0, 0, 1, 1, 1], [0], [0]>} : vector<2x8x8xf32>, vector<2x8x8xf32>, vector<2x8x8xf32> -> vector<2x8x8xf32>
    "tpu.trace_stop"() : () -> ()
    %cst_11 = arith.constant dense<0xFF800000> : vector<2x8xf32>
    %20 = vector.multi_reduction <maximumf>, %19, %cst_11 [2] : vector<2x8x8xf32> to vector<2x8xf32>
    %21 = vector.shape_cast %20 : vector<2x8xf32> to vector<2x8x1xf32>
    %22 = vector.broadcast %21 : vector<2x8x1xf32> to vector<2x8x8xf32>
    %23 = arith.subf %19, %22 : vector<2x8x8xf32>
    %24 = math.exp %23 : vector<2x8x8xf32>
    %cst_12 = arith.constant dense<0.000000e+00> : vector<2x8xf32>
    %25 = vector.multi_reduction <add>, %24, %cst_12 [2] : vector<2x8x8xf32> to vector<2x8xf32>
    %26 = vector.shape_cast %25 : vector<2x8xf32> to vector<2x8x1xf32>
    %27 = tpu.reciprocal %26 {approx = true} : vector<2x8x1xf32> -> vector<2x8x1xf32>
    %28 = vector.broadcast %27 : vector<2x8x1xf32> to vector<2x8x8xf32>
    %29 = arith.mulf %24, %28 : vector<2x8x8xf32>
    %30 = vector.extract_strided_slice %16 {offsets = [0, 0, 0], sizes = [2, 8, 8], strides = [1, 1, 1]} : vector<2x8x32xf32> to vector<2x8x8xf32>
    "tpu.trace_start"() <{level = 10 : i32, message = "bqk,bkd->bqd"}> : () -> ()
    %cst_13 = arith.constant dense<0.000000e+00> : vector<2x8x8xf32>
    %31 = tpu.matmul %29, %30, %cst_13 {dimension_numbers = #tpu.dot_dimension_numbers<[2], [1], [1], [2], [0, 0, 0, 1, 1, 2], [0], [0]>} : vector<2x8x8xf32>, vector<2x8x8xf32>, vector<2x8x8xf32> -> vector<2x8x8xf32>
    "tpu.trace_stop"() : () -> ()
    %32 = vector.extract_strided_slice %12 {offsets = [0, 0, 8], sizes = [2, 8, 8], strides = [1, 1, 1]} : vector<2x8x32xf32> to vector<2x8x8xf32>
    %33 = vector.extract_strided_slice %14 {offsets = [0, 0, 8], sizes = [2, 8, 8], strides = [1, 1, 1]} : vector<2x8x32xf32> to vector<2x8x8xf32>
    "tpu.trace_start"() <{level = 10 : i32, message = "bqd,bkd->bqk"}> : () -> ()
    %cst_14 = arith.constant dense<0.000000e+00> : vector<2x8x8xf32>
    %34 = tpu.matmul %32, %33, %cst_14 {dimension_numbers = #tpu.dot_dimension_numbers<[2], [2], [1], [1], [0, 0, 0, 1, 1, 1], [0], [0]>} : vector<2x8x8xf32>, vector<2x8x8xf32>, vector<2x8x8xf32> -> vector<2x8x8xf32>
    "tpu.trace_stop"() : () -> ()
    %cst_15 = arith.constant dense<0xFF800000> : vector<2x8xf32>
    %35 = vector.multi_reduction <maximumf>, %34, %cst_15 [2] : vector<2x8x8xf32> to vector<2x8xf32>
    %36 = vector.shape_cast %35 : vector<2x8xf32> to vector<2x8x1xf32>
    %37 = vector.broadcast %36 : vector<2x8x1xf32> to vector<2x8x8xf32>
    %38 = arith.subf %34, %37 : vector<2x8x8xf32>
    %39 = math.exp %38 : vector<2x8x8xf32>
    %cst_16 = arith.constant dense<0.000000e+00> : vector<2x8xf32>
    %40 = vector.multi_reduction <add>, %39, %cst_16 [2] : vector<2x8x8xf32> to vector<2x8xf32>
    %41 = vector.shape_cast %40 : vector<2x8xf32> to vector<2x8x1xf32>
    %42 = tpu.reciprocal %41 {approx = true} : vector<2x8x1xf32> -> vector<2x8x1xf32>
    %43 = vector.broadcast %42 : vector<2x8x1xf32> to vector<2x8x8xf32>
    %44 = arith.mulf %39, %43 : vector<2x8x8xf32>
    %45 = vector.extract_strided_slice %16 {offsets = [0, 0, 8], sizes = [2, 8, 8], strides = [1, 1, 1]} : vector<2x8x32xf32> to vector<2x8x8xf32>
    "tpu.trace_start"() <{level = 10 : i32, message = "bqk,bkd->bqd"}> : () -> ()
    %cst_17 = arith.constant dense<0.000000e+00> : vector<2x8x8xf32>
    %46 = tpu.matmul %44, %45, %cst_17 {dimension_numbers = #tpu.dot_dimension_numbers<[2], [1], [1], [2], [0, 0, 0, 1, 1, 2], [0], [0]>} : vector<2x8x8xf32>, vector<2x8x8xf32>, vector<2x8x8xf32> -> vector<2x8x8xf32>
    "tpu.trace_stop"() : () -> ()
    %47 = vector.extract_strided_slice %12 {offsets = [0, 0, 16], sizes = [2, 8, 8], strides = [1, 1, 1]} : vector<2x8x32xf32> to vector<2x8x8xf32>
    %48 = vector.extract_strided_slice %14 {offsets = [0, 0, 16], sizes = [2, 8, 8], strides = [1, 1, 1]} : vector<2x8x32xf32> to vector<2x8x8xf32>
    "tpu.trace_start"() <{level = 10 : i32, message = "bqd,bkd->bqk"}> : () -> ()
    %cst_18 = arith.constant dense<0.000000e+00> : vector<2x8x8xf32>
    %49 = tpu.matmul %47, %48, %cst_18 {dimension_numbers = #tpu.dot_dimension_numbers<[2], [2], [1], [1], [0, 0, 0, 1, 1, 1], [0], [0]>} : vector<2x8x8xf32>, vector<2x8x8xf32>, vector<2x8x8xf32> -> vector<2x8x8xf32>
    "tpu.trace_stop"() : () -> ()
    %cst_19 = arith.constant dense<0xFF800000> : vector<2x8xf32>
    %50 = vector.multi_reduction <maximumf>, %49, %cst_19 [2] : vector<2x8x8xf32> to vector<2x8xf32>
    %51 = vector.shape_cast %50 : vector<2x8xf32> to vector<2x8x1xf32>
    %52 = vector.broadcast %51 : vector<2x8x1xf32> to vector<2x8x8xf32>
    %53 = arith.subf %49, %52 : vector<2x8x8xf32>
    %54 = math.exp %53 : vector<2x8x8xf32>
    %cst_20 = arith.constant dense<0.000000e+00> : vector<2x8xf32>
    %55 = vector.multi_reduction <add>, %54, %cst_20 [2] : vector<2x8x8xf32> to vector<2x8xf32>
    %56 = vector.shape_cast %55 : vector<2x8xf32> to vector<2x8x1xf32>
    %57 = tpu.reciprocal %56 {approx = true} : vector<2x8x1xf32> -> vector<2x8x1xf32>
    %58 = vector.broadcast %57 : vector<2x8x1xf32> to vector<2x8x8xf32>
    %59 = arith.mulf %54, %58 : vector<2x8x8xf32>
    %60 = vector.extract_strided_slice %16 {offsets = [0, 0, 16], sizes = [2, 8, 8], strides = [1, 1, 1]} : vector<2x8x32xf32> to vector<2x8x8xf32>
    "tpu.trace_start"() <{level = 10 : i32, message = "bqk,bkd->bqd"}> : () -> ()
    %cst_21 = arith.constant dense<0.000000e+00> : vector<2x8x8xf32>
    %61 = tpu.matmul %59, %60, %cst_21 {dimension_numbers = #tpu.dot_dimension_numbers<[2], [1], [1], [2], [0, 0, 0, 1, 1, 2], [0], [0]>} : vector<2x8x8xf32>, vector<2x8x8xf32>, vector<2x8x8xf32> -> vector<2x8x8xf32>
    "tpu.trace_stop"() : () -> ()
    %62 = vector.extract_strided_slice %12 {offsets = [0, 0, 24], sizes = [2, 8, 8], strides = [1, 1, 1]} : vector<2x8x32xf32> to vector<2x8x8xf32>
    %63 = vector.extract_strided_slice %14 {offsets = [0, 0, 24], sizes = [2, 8, 8], strides = [1, 1, 1]} : vector<2x8x32xf32> to vector<2x8x8xf32>
    "tpu.trace_start"() <{level = 10 : i32, message = "bqd,bkd->bqk"}> : () -> ()
    %cst_22 = arith.constant dense<0.000000e+00> : vector<2x8x8xf32>
    %64 = tpu.matmul %62, %63, %cst_22 {dimension_numbers = #tpu.dot_dimension_numbers<[2], [2], [1], [1], [0, 0, 0, 1, 1, 1], [0], [0]>} : vector<2x8x8xf32>, vector<2x8x8xf32>, vector<2x8x8xf32> -> vector<2x8x8xf32>
    "tpu.trace_stop"() : () -> ()
    %cst_23 = arith.constant dense<0xFF800000> : vector<2x8xf32>
    %65 = vector.multi_reduction <maximumf>, %64, %cst_23 [2] : vector<2x8x8xf32> to vector<2x8xf32>
    %66 = vector.shape_cast %65 : vector<2x8xf32> to vector<2x8x1xf32>
    %67 = vector.broadcast %66 : vector<2x8x1xf32> to vector<2x8x8xf32>
    %68 = arith.subf %64, %67 : vector<2x8x8xf32>
    %69 = math.exp %68 : vector<2x8x8xf32>
    %cst_24 = arith.constant dense<0.000000e+00> : vector<2x8xf32>
    %70 = vector.multi_reduction <add>, %69, %cst_24 [2] : vector<2x8x8xf32> to vector<2x8xf32>
    %71 = vector.shape_cast %70 : vector<2x8xf32> to vector<2x8x1xf32>
    %72 = tpu.reciprocal %71 {approx = true} : vector<2x8x1xf32> -> vector<2x8x1xf32>
    %73 = vector.broadcast %72 : vector<2x8x1xf32> to vector<2x8x8xf32>
    %74 = arith.mulf %69, %73 : vector<2x8x8xf32>
    %75 = vector.extract_strided_slice %16 {offsets = [0, 0, 24], sizes = [2, 8, 8], strides = [1, 1, 1]} : vector<2x8x32xf32> to vector<2x8x8xf32>
    "tpu.trace_start"() <{level = 10 : i32, message = "bqk,bkd->bqd"}> : () -> ()
    %cst_25 = arith.constant dense<0.000000e+00> : vector<2x8x8xf32>
    %76 = tpu.matmul %74, %75, %cst_25 {dimension_numbers = #tpu.dot_dimension_numbers<[2], [1], [1], [2], [0, 0, 0, 1, 1, 2], [0], [0]>} : vector<2x8x8xf32>, vector<2x8x8xf32>, vector<2x8x8xf32> -> vector<2x8x8xf32>
    "tpu.trace_stop"() : () -> ()
    %77 = tpu.concatenate %31, %46, %61, %76 in 2 : vector<2x8x8xf32>, vector<2x8x8xf32>, vector<2x8x8xf32>, vector<2x8x8xf32> -> vector<2x8x32xf32>
    %78 = vector.shape_cast %77 : vector<2x8x32xf32> to vector<16x32xf32>
    %c0_26 = arith.constant 0 : index
    %c0_27 = arith.constant 0 : index
    %79 = vector.load %arg5[%c0_26, %c0_27] : memref<32x32xf32, #tpu.memory_space<vmem>>, vector<32x32xf32>
    %cst_28 = arith.constant dense<0.000000e+00> : vector<16x32xf32>
    %80 = tpu.matmul %78, %79, %cst_28 {dimension_numbers = #tpu.dot_dimension_numbers<[1], [0], [0], [1], [0, 0, 1, 1], [], []>} : vector<16x32xf32>, vector<32x32xf32>, vector<16x32xf32> -> vector<16x32xf32>
    %c0_29 = arith.constant 0 : index
    %c0_30 = arith.constant 0 : index
    %81 = vector.load %arg6[%c0_29, %c0_30] : memref<1x32xf32, #tpu.memory_space<vmem>>, vector<1x32xf32>
    %82 = vector.broadcast %81 : vector<1x32xf32> to vector<16x32xf32>
    %83 = arith.addf %80, %82 : vector<16x32xf32>
    %84 = arith.addf %3, %83 : vector<16x32xf32>
    %c0_31 = arith.constant 0 : index
    %c0_32 = arith.constant 0 : index
    %85 = vector.load %arg7[%c0_31, %c0_32] : memref<1x32xf32, #tpu.memory_space<vmem>>, vector<1x32xf32>
    %c0_33 = arith.constant 0 : index
    %c0_34 = arith.constant 0 : index
    %86 = vector.load %arg8[%c0_33, %c0_34] : memref<1x32xf32, #tpu.memory_space<vmem>>, vector<1x32xf32>
    %cst_35 = arith.constant dense<0.000000e+00> : vector<16xf32>
    %87 = vector.multi_reduction <add>, %84, %cst_35 [1] : vector<16x32xf32> to vector<16xf32>
    %88 = vector.shape_cast %87 : vector<16xf32> to vector<16x1xf32>
    %cst_36 = arith.constant 3.200000e+01 : f32
    %89 = vector.broadcast %cst_36 : f32 to vector<16x1xf32>
    %90 = arith.divf %88, %89 : vector<16x1xf32>
    %91 = vector.broadcast %90 : vector<16x1xf32> to vector<16x32xf32>
    %92 = arith.subf %84, %91 : vector<16x32xf32>
    %93 = arith.mulf %92, %92 : vector<16x32xf32>
    %cst_37 = arith.constant dense<0.000000e+00> : vector<16xf32>
    %94 = vector.multi_reduction <add>, %93, %cst_37 [1] : vector<16x32xf32> to vector<16xf32>
    %95 = vector.shape_cast %94 : vector<16xf32> to vector<16x1xf32>
    %cst_38 = arith.constant 3.200000e+01 : f32
    %96 = vector.broadcast %cst_38 : f32 to vector<16x1xf32>
    %97 = arith.divf %95, %96 : vector<16x1xf32>
    %cst_39 = arith.constant 9.99999974E-6 : f32
    %98 = vector.broadcast %cst_39 : f32 to vector<16x1xf32>
    %99 = arith.addf %97, %98 : vector<16x1xf32>
    %100 = math.rsqrt %99 : vector<16x1xf32>
    %101 = vector.broadcast %100 : vector<16x1xf32> to vector<16x32xf32>
    %102 = arith.mulf %92, %101 : vector<16x32xf32>
    %103 = vector.broadcast %85 : vector<1x32xf32> to vector<16x32xf32>
    %104 = arith.mulf %102, %103 : vector<16x32xf32>
    %105 = vector.broadcast %86 : vector<1x32xf32> to vector<16x32xf32>
    %106 = arith.addf %104, %105 : vector<16x32xf32>
    %c0_40 = arith.constant 0 : index
    %c0_41 = arith.constant 0 : index
    %107 = vector.load %arg9[%c0_40, %c0_41] : memref<32x128xf32, #tpu.memory_space<vmem>>, vector<32x128xf32>
    %cst_42 = arith.constant dense<0.000000e+00> : vector<16x128xf32>
    %108 = tpu.matmul %106, %107, %cst_42 {dimension_numbers = #tpu.dot_dimension_numbers<[1], [0], [0], [1], [0, 0, 1, 1], [], []>} : vector<16x32xf32>, vector<32x128xf32>, vector<16x128xf32> -> vector<16x128xf32>
    %c0_43 = arith.constant 0 : index
    %c0_44 = arith.constant 0 : index
    %109 = vector.load %arg10[%c0_43, %c0_44] : memref<1x128xf32, #tpu.memory_space<vmem>>, vector<1x128xf32>
    %110 = vector.broadcast %109 : vector<1x128xf32> to vector<16x128xf32>
    %111 = arith.addf %108, %110 : vector<16x128xf32>
    %cst_45 = arith.constant 0.000000e+00 : f32
    %112 = vector.broadcast %cst_45 : f32 to vector<16x128xf32>
    %113 = arith.maximumf %111, %112 : vector<16x128xf32>
    %c0_46 = arith.constant 0 : index
    %c0_47 = arith.constant 0 : index
    %114 = vector.load %arg11[%c0_46, %c0_47] : memref<128x32xf32, #tpu.memory_space<vmem>>, vector<128x32xf32>
    %cst_48 = arith.constant dense<0.000000e+00> : vector<16x32xf32>
    %115 = tpu.matmul %113, %114, %cst_48 {dimension_numbers = #tpu.dot_dimension_numbers<[1], [0], [0], [1], [0, 0, 1, 1], [], []>} : vector<16x128xf32>, vector<128x32xf32>, vector<16x32xf32> -> vector<16x32xf32>
    %c0_49 = arith.constant 0 : index
    %c0_50 = arith.constant 0 : index
    %116 = vector.load %arg12[%c0_49, %c0_50] : memref<1x32xf32, #tpu.memory_space<vmem>>, vector<1x32xf32>
    %117 = vector.broadcast %116 : vector<1x32xf32> to vector<16x32xf32>
    %118 = arith.addf %115, %117 : vector<16x32xf32>
    %119 = arith.addf %106, %118 : vector<16x32xf32>
    %c0_51 = arith.constant 0 : index
    %c0_52 = arith.constant 0 : index
    %120 = vector.load %arg13[%c0_51, %c0_52] : memref<1x32xf32, #tpu.memory_space<vmem>>, vector<1x32xf32>
    %c0_53 = arith.constant 0 : index
    %c0_54 = arith.constant 0 : index
    %121 = vector.load %arg14[%c0_53, %c0_54] : memref<1x32xf32, #tpu.memory_space<vmem>>, vector<1x32xf32>
    %cst_55 = arith.constant dense<0.000000e+00> : vector<16xf32>
    %122 = vector.multi_reduction <add>, %119, %cst_55 [1] : vector<16x32xf32> to vector<16xf32>
    %123 = vector.shape_cast %122 : vector<16xf32> to vector<16x1xf32>
    %cst_56 = arith.constant 3.200000e+01 : f32
    %124 = vector.broadcast %cst_56 : f32 to vector<16x1xf32>
    %125 = arith.divf %123, %124 : vector<16x1xf32>
    %126 = vector.broadcast %125 : vector<16x1xf32> to vector<16x32xf32>
    %127 = arith.subf %119, %126 : vector<16x32xf32>
    %128 = arith.mulf %127, %127 : vector<16x32xf32>
    %cst_57 = arith.constant dense<0.000000e+00> : vector<16xf32>
    %129 = vector.multi_reduction <add>, %128, %cst_57 [1] : vector<16x32xf32> to vector<16xf32>
    %130 = vector.shape_cast %129 : vector<16xf32> to vector<16x1xf32>
    %cst_58 = arith.constant 3.200000e+01 : f32
    %131 = vector.broadcast %cst_58 : f32 to vector<16x1xf32>
    %132 = arith.divf %130, %131 : vector<16x1xf32>
    %cst_59 = arith.constant 9.99999974E-6 : f32
    %133 = vector.broadcast %cst_59 : f32 to vector<16x1xf32>
    %134 = arith.addf %132, %133 : vector<16x1xf32>
    %135 = math.rsqrt %134 : vector<16x1xf32>
    %136 = vector.broadcast %135 : vector<16x1xf32> to vector<16x32xf32>
    %137 = arith.mulf %127, %136 : vector<16x32xf32>
    %138 = vector.broadcast %120 : vector<1x32xf32> to vector<16x32xf32>
    %139 = arith.mulf %137, %138 : vector<16x32xf32>
    %140 = vector.broadcast %121 : vector<1x32xf32> to vector<16x32xf32>
    %141 = arith.addf %139, %140 : vector<16x32xf32>
    %142 = vector.shape_cast %141 : vector<16x32xf32> to vector<2x8x32xf32>
    %c0_60 = arith.constant 0 : index
    %c0_61 = arith.constant 0 : index
    %c0_62 = arith.constant 0 : index
    %143 = vector.load %arg15[%c0_60, %c0_61, %c0_62] : memref<2x8x32xf32, #tpu.memory_space<vmem>>, vector<2x8x32xf32>
    tpu.vector_store %arg15[%c0_60, %c0_61, %c0_62], %142 {strides = array<i32>} : memref<2x8x32xf32, #tpu.memory_space<vmem>>, vector<2x8x32xf32>,
    return
  }
  func.func @transform_0(%arg0: i32) -> (i32, i32, i32) {
    %c0_i32 = arith.constant 0 : i32
    %c0_i32_0 = arith.constant 0 : i32
    %c0_i32_1 = arith.constant 0 : i32
    return %arg0, %c0_i32, %c0_i32_0 : i32, i32, i32
  }
  func.func @transform_1(%arg0: i32) -> (i32, i32, i32) {
    %c0_i32 = arith.constant 0 : i32
    %c0_i32_0 = arith.constant 0 : i32
    %c0_i32_1 = arith.constant 0 : i32
    return %arg0, %c0_i32, %c0_i32_0 : i32, i32, i32
  }
  func.func @transform_2(%arg0: i32) -> (i32, i32) {
    %c0_i32 = arith.constant 0 : i32
    %c0_i32_0 = arith.constant 0 : i32
    %c0_i32_1 = arith.constant 0 : i32
    return %c0_i32, %c0_i32_0 : i32, i32
  }
  func.func @transform_3(%arg0: i32) -> (i32, i32) {
    %c0_i32 = arith.constant 0 : i32
    %c0_i32_0 = arith.constant 0 : i32
    %c0_i32_1 = arith.constant 0 : i32
    return %c0_i32, %c0_i32_0 : i32, i32
  }
  func.func @transform_4(%arg0: i32) -> (i32, i32) {
    %c0_i32 = arith.constant 0 : i32
    %c0_i32_0 = arith.constant 0 : i32
    %c0_i32_1 = arith.constant 0 : i32
    return %c0_i32, %c0_i32_0 : i32, i32
  }
  func.func @transform_5(%arg0: i32) -> (i32, i32) {
    %c0_i32 = arith.constant 0 : i32
    %c0_i32_0 = arith.constant 0 : i32
    %c0_i32_1 = arith.constant 0 : i32
    return %c0_i32, %c0_i32_0 : i32, i32
  }
  func.func @transform_6(%arg0: i32) -> (i32, i32) {
    %c0_i32 = arith.constant 0 : i32
    %c0_i32_0 = arith.constant 0 : i32
    %c0_i32_1 = arith.constant 0 : i32
    return %c0_i32, %c0_i32_0 : i32, i32
  }
  func.func @transform_7(%arg0: i32) -> (i32, i32) {
    %c0_i32 = arith.constant 0 : i32
    %c0_i32_0 = arith.constant 0 : i32
    %c0_i32_1 = arith.constant 0 : i32
    return %c0_i32, %c0_i32_0 : i32, i32
  }
  func.func @transform_8(%arg0: i32) -> (i32, i32) {
    %c0_i32 = arith.constant 0 : i32
    %c0_i32_0 = arith.constant 0 : i32
    %c0_i32_1 = arith.constant 0 : i32
    return %c0_i32, %c0_i32_0 : i32, i32
  }
  func.func @transform_9(%arg0: i32) -> (i32, i32) {
    %c0_i32 = arith.constant 0 : i32
    %c0_i32_0 = arith.constant 0 : i32
    %c0_i32_1 = arith.constant 0 : i32
    return %c0_i32, %c0_i32_0 : i32, i32
  }
  func.func @transform_10(%arg0: i32) -> (i32, i32) {
    %c0_i32 = arith.constant 0 : i32
    %c0_i32_0 = arith.constant 0 : i32
    %c0_i32_1 = arith.constant 0 : i32
    return %c0_i32, %c0_i32_0 : i32, i32
  }
  func.func @transform_11(%arg0: i32) -> (i32, i32) {
    %c0_i32 = arith.constant 0 : i32
    %c0_i32_0 = arith.constant 0 : i32
    %c0_i32_1 = arith.constant 0 : i32
    return %c0_i32, %c0_i32_0 : i32, i32
  }
  func.func @transform_12(%arg0: i32) -> (i32, i32) {
    %c0_i32 = arith.constant 0 : i32
    %c0_i32_0 = arith.constant 0 : i32
    %c0_i32_1 = arith.constant 0 : i32
    return %c0_i32, %c0_i32_0 : i32, i32
  }
  func.func @transform_13(%arg0: i32) -> (i32, i32) {
    %c0_i32 = arith.constant 0 : i32
    %c0_i32_0 = arith.constant 0 : i32
    %c0_i32_1 = arith.constant 0 : i32
    return %c0_i32, %c0_i32_0 : i32, i32
  }
  func.func @transform_14(%arg0: i32) -> (i32, i32, i32) {
    %c0_i32 = arith.constant 0 : i32
    %c0_i32_0 = arith.constant 0 : i32
    %c0_i32_1 = arith.constant 0 : i32
    return %arg0, %c0_i32, %c0_i32_0 : i32, i32, i32
  }
}

</mosaic_0001>

<bundles_post_ra>
// kernel: self_att_pallas.1
= control target key start
LH: loop header
LB: loop body
LE: loop exit
PB: predicated region body
PF: predicated region fallthrough
CT: control target
= control target key end

     0   :  { %vm58_vm0 = vcmask 1043456   ;;  %vm69_vm1 = vcmask 261120   ;;  %s1376_s0 = inlined_call_operand.vmem [shape: f32[2,4,32], index: 0, kind: input, shape index: {}]   ;;  %s1377_s1 = inlined_call_operand.vmem [shape: f32[2,4,32], index: 1, kind: input, shape index: {}]   ;;  %s1378_s2 = inlined_call_operand.vmem [shape: f32[32,96], index: 2, kind: input, shape index: {}]   ;;  %s1379_s3 = inlined_call_operand.vmem [shape: f32[1,96], index: 3, kind: input, shape index: {}]   ;;  %s1380_s4 = inlined_call_operand.vmem [shape: f32[32,32], index: 4, kind: input, shape index: {}]   ;;  %s1381_s5 = inlined_call_operand.vmem [shape: f32[1,32], index: 5, kind: input, shape index: {}]   ;;  %s1382_s6 = inlined_call_operand.vmem [shape: f32[1,32], index: 6, kind: input, shape index: {}]   ;;  %s1383_s7 = inlined_call_operand.vmem [shape: f32[1,32], index: 7, kind: input, shape index: {}]   ;;  %s1384_s8 = inlined_call_operand.vmem [shape: f32[32,128], index: 8, kind: input, shape index: {}]   ;;  %s1385_s9 = inlined_call_operand.vmem [shape: f32[1,128], index: 9, kind: input, shape index: {}]   ;;  %s1386_s10 = inlined_call_operand.vmem [shape: f32[128,32], index: 10, kind: input, shape index: {}]   ;;  %s1387_s11 = inlined_call_operand.vmem [shape: f32[1,32], index: 11, kind: input, shape index: {}]   ;;  %s1388_s12 = inlined_call_operand.vmem [shape: f32[1,32], index: 12, kind: input, shape index: {}]   ;;  %s1389_s13 = inlined_call_operand.vmem [shape: f32[1,32], index: 13, kind: input, shape index: {}]   ;;  %s1390_s14 = inlined_call_operand.hbm [shape: f32[2,8,32], index: 14, kind: output, shape index: {}]  }
   0x1   :  { %v64_v0 = vld [vmem:[%s1378_s2 + $0x18] sm:$0xff]  ;;  %v63_v1 = vld [vmem:[%s1378_s2 + $0x10] sm:$0xff]  ;;  %v50_v2 = vld [vmem:[%s1377_s1] sm:$0xf] }
   0x2   :  { %88 = vmatpush.msra.mxu0 %v64_v0  ;;  %v62_v3 = vld [vmem:[%s1378_s2 + $0x8] sm:$0xff]  ;;  %v48_v4 = vld [vmem:[%s1376_s0] sm:$0xf]  ;;  %v54_v5 = vrot.slane %v50_v2, 4  ;;  %v51_v8 = vld [vmem:[%s1377_s1 + $0x4] sm:$0xf] }
   0x3   :  { %v61_v6 = vld [vmem:[%s1378_s2] sm:$0xff] }
   0x4   :  { %89 = vmatpush.msra.mxu0 %v63_v1  ;;  %v1149_v7 = vsel %vm58_vm0, %v48_v4, %v54_v5 }
   0x6   :  { %90 = vmatpush.msra.mxu0 %v62_v3 }
   0x7   :  { %19 = vsyncpa [#allocation3], 0  ;;  %v55_v9 = vrot.slane %v51_v8, 4  ;;  %v49_v10 = vld [vmem:[%s1376_s0 + $0x4] sm:$0xf]  ;;  %s1039_s1 = smov 96  }
   0x8   :  { %91 = vmatpush.msra.mxu0 %v61_v6  ;;  %v963_v12 = vld [vmem:[%s1379_s3] ss:$0 sm:$0xff]  ;;  %s1040_s0 = smov 64   ;;  %s1041_s30 = smov 120   ;;  %vm104_vm2 = vcmask 64512   ;;  %vm648_vm3 = vcmask 130048  }
   0x9   :  { %916 = vmatmul.msk.f32.vlgmr.msra.gmra.mxu0 %vm69_vm1, %v1149_v7  ;;  %v1159_v11 = vsel %vm58_vm0, %v49_v10, %v55_v9  ;;  %s1042_s3 = smov 88   ;;  %s1043_s15 = smov 56   ;;  %vm651_vm4 = vcmask 195584  }
   0xa   :  { %s1044_s16 = smov 80   ;;  %s1045_s17 = smov 112  }
   0xb   :  { %s1046_s18 = smov 104   ;;  %s1047_s19 = smov 72  }
   0xc   :  { %s1048_s20 = smov 48   ;;  %s1049_s21 = smov 40  }
   0xd   :  { %s1050_s22 = smov 8   ;;  %s1051_s23 = smov 16  }
   0xe   :  { %s1052_s24 = smov 24  }
  0x11   :  { %917 = vmatmul.msk.f32.gmra.mxu0 %vm69_vm1, %v1159_v11 }
  0x86   :  { %v93_v13 = vpop.f32.mrf.mxu0 }
  0x87   :  { %v1166_v14 = vadd.f32 %v963_v12, %v93_v13 }
  0x89   :  { %102 = vrot.lane.b32.xlu0 %v1166_v14, %s1039_s1  ;;  %v99_v17 = vmul.f32 0.35355338, %v1166_v14 }
  0x8e   :  { %v96_v15 = vpop.f32.mrf.mxu0 }
  0x8f   :  { %v1169_v16 = vadd.f32 %v963_v12, %v96_v15 }
  0x91   :  { %131 = vrot.lane.b32.xlu0 %v1169_v16, %s1039_s1  ;;  %v100_v20 = vmul.f32 0.35355338, %v1169_v16 }
  0x99   :  { %180 = vrot.lane.b32.xlu0 %v1166_v14, %s1040_s0 }
  0xa1   :  { %232 = vrot.lane.b32.xlu0 %v99_v17, %s1041_s30 }
  0xfb   :  { %v103_v18 = vpop.permute.xlu0 %102 }
  0xfc   :  { %918 = vmatpush.xpose.msk.msra.mxu1 %vm104_vm2, %v103_v18 }
  0xff   :  { %919 = vmatmul.msk.f32.vlgmr.msra.gmra.mxu1 %vm104_vm2, %v99_v17 }
 0x103   :  { %v132_v19 = vpop.permute.xlu0 %131 }
 0x104   :  { %920 = vmatpush.xpose.msk.msra.mxu2 %vm104_vm2, %v132_v19 }
 0x107   :  { %921 = vmatmul.msk.f32.vlgmr.msra.gmra.mxu2 %vm104_vm2, %v100_v20 }
 0x10b   :  { %v181_v21 = vpop.permute.xlu0 %180 }
 0x10c   :  { %201 = vmatpush.msrb.mxu1 %v181_v21 }
 0x113   :  { %v233_v45 = vpop.permute.xlu0 %232 }
 0x17c   :  { %v127_v22 = vpop.f32.mrf.mxu1 }
 0x17d   :  { %v158_v23 = vsel %vm104_vm2, %v127_v22, -inf }
 0x17e   :  { %159 = vmax.xlane.f32.xlu1 %v158_v23 }
 0x18a   :  { %v155_v24 = vpop.f32.mrf.mxu2 }
 0x18b   :  { %v161_v25 = vsel %vm104_vm2, %v155_v24, -inf }
 0x18c   :  { %162 = vmax.xlane.f32.xlu1 %v161_v25 }
 0x1a5   :  { %206 = vrot.lane.b32.xlu1 %v1169_v16, %s1040_s0 }
 0x1f1   :  { %v160_v26 = vpop.xlane.xlu1 %159 }
 0x1f2   :  { %v164_v27 = vsub.f32 %v127_v22, %v160_v26 }
 0x1f4   :  { %v166_v28 = vmul.f32 1.442695, %v164_v27 }
 0x1f6   :  { %971 = vpow2.f32 %v166_v28 }
 0x1fc   :  { %v972_v29 = vpop.eup %971 }
 0x1fd   :  { %v170_v30 = vsel %vm104_vm2, %v972_v29, 0.0 }
 0x1fe   :  { %171 = vadd.xlane.f32.xlu2 %v170_v30 }
 0x1ff   :  { %v163_v31 = vpop.xlane.xlu1 %162 }
 0x200   :  { %v165_v32 = vsub.f32 %v155_v24, %v163_v31 }
 0x202   :  { %v168_v33 = vmul.f32 1.442695, %v165_v32 }
 0x204   :  { %973 = vpow2.f32 %v168_v33 }
 0x20a   :  { %v974_v34 = vpop.eup %973 }
 0x20b   :  { %v173_v35 = vsel %vm104_vm2, %v974_v34, 0.0 }
 0x20c   :  { %174 = vadd.xlane.f32.xlu2 %v173_v35 }
 0x217   :  { %v207_v36 = vpop.permute.xlu1 %206 }
 0x218   :  { %227 = vmatpush.msra.mxu1 %v207_v36 }
 0x224   :  { %234 = vrot.lane.b32.xlu2 %v1166_v14, %s1042_s3 }
 0x22c   :  { %262 = vrot.lane.b32.xlu2 %v1169_v16, %s1042_s3 }
 0x234   :  { %260 = vrot.lane.b32.xlu2 %v100_v20, %s1041_s30 }
 0x23c   :  { %310 = vrot.lane.b32.xlu2 %v1166_v14, %s1043_s15 }
 0x244   :  { %364 = vrot.lane.b32.xlu2 %v1166_v14, %s1044_s16 }
 0x24c   :  { %362 = vrot.lane.b32.xlu2 %v99_v17, %s1045_s17 }
 0x254   :  { %492 = vrot.lane.b32.xlu2 %v99_v17, %s1046_s18 }
 0x25c   :  { %390 = vrot.lane.b32.xlu2 %v100_v20, %s1045_s17  ;;  %s1055_s17 = smov 128  }
 0x264   :  { %520 = vrot.lane.b32.xlu2 %v100_v20, %s1046_s18 }
 0x271   :  { %v172_v37 = vpop.xlane.xlu2 %171 }
 0x272   :  { %975 = vrcp.f32 %v172_v37 }
 0x278   :  { %v976_v38 = vpop.eup %975 }
 0x279   :  { %v178_v39 = vmul.f32 %v976_v38, %v972_v29 }
 0x27b   :  { %922 = vmatmul.msk.f32.vlgmr.msrb.gmra.mxu1 %vm104_vm2, %v178_v39 }
 0x27f   :  { %v175_v40 = vpop.xlane.xlu2 %174 }
 0x280   :  { %977 = vrcp.f32 %v175_v40 }
 0x286   :  { %v978_v41 = vpop.eup %977 }
 0x287   :  { %v179_v42 = vmul.f32 %v978_v41, %v974_v34  ;;  %v235_v43 = vpop.permute.xlu2 %234 }
 0x288   :  { %924 = vmatpush.xpose.msk.msrb.mxu1 %vm104_vm2, %v235_v43 }
 0x289   :  { %923 = vmatmul.msk.f32.vlgmr.msra.gmra.mxu1 %vm104_vm2, %v179_v42 }
 0x28f   :  { %v263_v44 = vpop.permute.xlu2 %262 }
 0x290   :  { %926 = vmatpush.xpose.msk.msrb.mxu2 %vm104_vm2, %v263_v44 }
 0x291   :  { %925 = vmatmul.msk.f32.vlgmr.msrb.gmra.mxu1 %vm104_vm2, %v233_v45 }
 0x297   :  { %v261_v46 = vpop.permute.xlu2 %260 }
 0x298   :  { %927 = vmatmul.msk.f32.vlgmr.msrb.gmra.mxu2 %vm104_vm2, %v261_v46 }
 0x29f   :  { %v311_v47 = vpop.permute.xlu2 %310 }
 0x2a0   :  { %331 = vmatpush.msra.mxu2 %v311_v47 }
 0x2a7   :  { %v365_v48 = vpop.permute.xlu2 %364 }
 0x2a8   :  { %930 = vmatpush.xpose.msk.msrb.mxu2 %vm104_vm2, %v365_v48 }
 0x2af   :  { %v363_v61 = vpop.permute.xlu2 %362 }
 0x2b7   :  { %v493_v1 = vpop.permute.xlu2 %492 }
 0x2bf   :  { %v391_v3 = vpop.permute.xlu2 %390 }
 0x2c7   :  { %v521_v5 = vpop.permute.xlu2 %520 }
 0x2f8   :  { %v1199_v49 = vpop.f32.mrf.mxu1 }
 0x306   :  { %v1201_v50 = vpop.f32.mrf.mxu1 }
 0x30e   :  { %v257_v51 = vpop.f32.mrf.mxu1 }
 0x30f   :  { %v288_v52 = vsel %vm104_vm2, %v257_v51, -inf }
 0x310   :  { %289 = vmax.xlane.f32.xlu0 %v288_v52 }
 0x31b   :  { %v285_v53 = vpop.f32.mrf.mxu2 }
 0x31c   :  { %v291_v54 = vsel %vm104_vm2, %v285_v53, -inf }
 0x31d   :  { %292 = vmax.xlane.f32.xlu2 %v291_v54 }
 0x324   :  { %494 = vrot.lane.b32.xlu0 %v1166_v14, %s1047_s19 }
 0x32c   :  { %522 = vrot.lane.b32.xlu0 %v1169_v16, %s1047_s19 }
 0x383   :  { %v290_v55 = vpop.xlane.xlu0 %289 }
 0x384   :  { %v294_v56 = vsub.f32 %v257_v51, %v290_v55 }
 0x386   :  { %v296_v57 = vmul.f32 1.442695, %v294_v56 }
 0x388   :  { %979 = vpow2.f32 %v296_v57 }
 0x38e   :  { %v980_v58 = vpop.eup %979 }
 0x38f   :  { %v300_v59 = vsel %vm104_vm2, %v980_v58, 0.0 }
 0x390   :  { %301 = vadd.xlane.f32.xlu1 %v300_v59  ;;  %v293_v8 = vpop.xlane.xlu2 %292 }
 0x391   :  { %v295_v9 = vsub.f32 %v285_v53, %v293_v8  ;;  %v655_v8 = vld [vmem:[%s1380_s4 + $0x8] sm:$0xff] }
 0x393   :  { %v298_v13 = vmul.f32 1.442695, %v295_v9  ;;  %v654_v9 = vld [vmem:[%s1380_s4] sm:$0xff] }
 0x396   :  { %v495_v0 = vpop.permute.xlu0 %494 }
 0x39e   :  { %v523_v4 = vpop.permute.xlu0 %522 }
 0x3a9   :  { %392 = vrot.lane.b32.xlu1 %v1169_v16, %s1044_s16  ;;  %s904_s16 = sshll.u32 %s1390_s14, 4  ;;  %s905_s16 = int_to_ptr.hbm [resolvable:$true] %s904_s16 }
 0x403   :  { %v302_v60 = vpop.xlane.xlu1 %301 }
 0x404   :  { %981 = vrcp.f32 %v302_v60 }
 0x405   :  { %983 = vpow2.f32 %v298_v13 }
 0x40a   :  { %v982_v62 = vpop.eup %981 }
 0x40b   :  { %v308_v63 = vmul.f32 %v982_v62, %v980_v58  ;;  %v984_v22 = vpop.eup %983 }
 0x40c   :  { %v303_v23 = vsel %vm104_vm2, %v984_v22, 0.0 }
 0x40d   :  { %928 = vmatmul.msk.f32.vlgmr.msra.gmra.mxu2 %vm104_vm2, %v308_v63 }
 0x40e   :  { %936 = vmatpush.xpose.msk.msra.mxu2 %vm104_vm2, %v495_v0 }
 0x415   :  { %931 = vmatmul.msk.f32.vlgmr.msrb.gmra.mxu2 %vm104_vm2, %v363_v61 }
 0x41b   :  { %v393_v2 = vpop.permute.xlu1 %392 }
 0x41c   :  { %932 = vmatpush.xpose.msk.msrb.mxu0 %vm104_vm2, %v393_v2 }
 0x41d   :  { %937 = vmatmul.msk.f32.vlgmr.msra.gmra.mxu2 %vm104_vm2, %v493_v1 }
 0x41f   :  { %933 = vmatmul.msk.f32.vlgmr.msrb.gmra.mxu0 %vm104_vm2, %v391_v3 }
 0x420   :  { %938 = vmatpush.xpose.msk.msra.mxu0 %vm104_vm2, %v523_v4 }
 0x427   :  { %939 = vmatmul.msk.f32.vlgmr.msra.gmra.mxu0 %vm104_vm2, %v521_v5  ;;  %v657_v5 = vld [vmem:[%s1380_s4 + $0x18] sm:$0xff] }
 0x428   :  { %680 = vmatpush.msrb.mxu2 %v657_v5 }
 0x490   :  { %v333_v6 = vpop.f32.mrf.mxu2 }
 0x498   :  { %v387_v10 = vpop.f32.mrf.mxu2 }
 0x499   :  { %v418_v12 = vsel %vm104_vm2, %v387_v10, -inf }
 0x49a   :  { %419 = vmax.xlane.f32.xlu0 %v418_v12 }
 0x49c   :  { %v415_v15 = vpop.f32.mrf.mxu0 }
 0x49d   :  { %v421_v18 = vsel %vm104_vm2, %v415_v15, -inf }
 0x4a0   :  { %v517_v17 = vpop.f32.mrf.mxu2 }
 0x4a1   :  { %v548_v19 = vsel %vm104_vm2, %v517_v17, -inf }
 0x4a2   :  { %422 = vmax.xlane.f32.xlu0 %v421_v18  ;;  %549 = vmax.xlane.f32.xlu1 %v548_v19 }
 0x4a4   :  { %v545_v20 = vpop.f32.mrf.mxu0 }
 0x4a5   :  { %v551_v21 = vsel %vm104_vm2, %v545_v20, -inf }
 0x4a6   :  { %552 = vmax.xlane.f32.xlu2 %v551_v21 }
 0x4aa   :  { %304 = vadd.xlane.f32.xlu0 %v303_v23 }
 0x4be   :  { %336 = vrot.lane.b32.xlu2 %v1169_v16, %s1043_s15 }
 0x50d   :  { %v420_v24 = vpop.xlane.xlu0 %419 }
 0x50e   :  { %v424_v25 = vsub.f32 %v387_v10, %v420_v24 }
 0x510   :  { %v426_v26 = vmul.f32 1.442695, %v424_v25 }
 0x512   :  { %985 = vpow2.f32 %v426_v26 }
 0x515   :  { %v550_v27 = vpop.xlane.xlu1 %549  ;;  %v423_v28 = vpop.xlane.xlu0 %422 }
 0x516   :  { %v554_v29 = vsub.f32 %v517_v17, %v550_v27  ;;  %v425_v30 = vsub.f32 %v415_v15, %v423_v28 }
 0x518   :  { %v986_v31 = vpop.eup %985  ;;  %v556_v32 = vmul.f32 1.442695, %v554_v29  ;;  %v428_v33 = vmul.f32 1.442695, %v425_v30 }
 0x519   :  { %v553_v34 = vpop.xlane.xlu2 %552  ;;  %v430_v35 = vsel %vm104_vm2, %v986_v31, 0.0 }
 0x51a   :  { %987 = vpow2.f32 %v556_v32  ;;  %431 = vadd.xlane.f32.xlu1 %v430_v35  ;;  %v555_v44 = vsub.f32 %v545_v20, %v553_v34  ;;  %v1053_v32 = vmov 32.0  }
 0x51b   :  { %989 = vpow2.f32 %v428_v33 }
 0x51c   :  { %v558_v45 = vmul.f32 1.442695, %v555_v44 }
 0x51d   :  { %v305_v36 = vpop.xlane.xlu0 %304 }
 0x51e   :  { %991 = vrcp.f32 %v305_v36 }
 0x51f   :  { %993 = vpow2.f32 %v558_v45 }
 0x520   :  { %v988_v37 = vpop.eup %987 }
 0x521   :  { %v990_v38 = vpop.eup %989  ;;  %v337_v39 = vpop.permute.xlu2 %336  ;;  %v560_v40 = vsel %vm104_vm2, %v988_v37, 0.0 }
 0x522   :  { %561 = vadd.xlane.f32.xlu2 %v560_v40  ;;  %357 = vmatpush.msra.mxu1 %v337_v39  ;;  %v433_v41 = vsel %vm104_vm2, %v990_v38, 0.0 }
 0x523   :  { %434 = vadd.xlane.f32.xlu0 %v433_v41 }
 0x524   :  { %v992_v42 = vpop.eup %991 }
 0x525   :  { %v309_v43 = vmul.f32 %v992_v42, %v984_v22  ;;  %v994_v46 = vpop.eup %993 }
 0x526   :  { %v563_v47 = vsel %vm104_vm2, %v994_v46, 0.0 }
 0x527   :  { %929 = vmatmul.msk.f32.vlgmr.msra.gmra.mxu1 %vm104_vm2, %v309_v43 }
 0x533   :  { %440 = vrot.lane.b32.xlu1 %v1166_v14, %s1048_s20 }
 0x537   :  { %570 = vrot.lane.b32.xlu0 %v1166_v14, %s1049_s21 }
 0x53a   :  { %466 = vrot.lane.b32.xlu2 %v1169_v16, %s1048_s20 }
 0x53f   :  { %596 = vrot.lane.b32.xlu0 %v1169_v16, %s1049_s21 }
 0x542   :  { %624 = vrot.lane.b32.xlu2 %v333_v6, %s1050_s22  ;;  %v656_v6 = vld [vmem:[%s1380_s4 + $0x10] sm:$0xff] }
 0x543   :  { %681 = vmatpush.msrb.mxu2 %v656_v6 }
 0x545   :  { %682 = vmatpush.msrb.mxu2 %v655_v8  ;;  %v807_v8 = vld [vmem:[%s1386_s10 + $0x60] sm:$0xff] }
 0x547   :  { %683 = vmatpush.msrb.mxu2 %v654_v9 }
 0x55d   :  { %564 = vadd.xlane.f32.xlu1 %v563_v47  ;;  %v759_v47 = vld [vmem:[%s1384_s8 + $0x18] sm:$0xff] }
 0x55e   :  { %782 = vmatpush.msrb.mxu0 %v759_v47 }
 0x58d   :  { %v432_v52 = vpop.xlane.xlu1 %431 }
 0x595   :  { %v562_v48 = vpop.xlane.xlu2 %561 }
 0x596   :  { %v435_v51 = vpop.xlane.xlu0 %434 }
 0x597   :  { %995 = vrcp.f32 %v435_v51  ;;  %v757_v51 = vld [vmem:[%s1384_s8 + $0x8] sm:$0xff] }
 0x598   :  { %997 = vrcp.f32 %v432_v52  ;;  %v756_v52 = vld [vmem:[%s1384_s8] sm:$0xff] }
 0x599   :  { %999 = vrcp.f32 %v562_v48  ;;  %v758_v48 = vld [vmem:[%s1384_s8 + $0x10] sm:$0xff] }
 0x59a   :  { %783 = vmatpush.msrb.mxu0 %v758_v48 }
 0x59c   :  { %784 = vmatpush.msrb.mxu0 %v757_v51 }
 0x59d   :  { %v996_v53 = vpop.eup %995  ;;  %v467_v14 = vpop.permute.xlu2 %466 }
 0x59e   :  { %v439_v54 = vmul.f32 %v996_v53, %v990_v38  ;;  %487 = vmatpush.msrb.mxu1 %v467_v14  ;;  %v998_v16 = vpop.eup %997  ;;  %785 = vmatpush.msrb.mxu0 %v756_v52 }
 0x59f   :  { %v438_v56 = vmul.f32 %v998_v16, %v986_v31  ;;  %v1000_v58 = vpop.eup %999 }
 0x5a0   :  { %935 = vmatmul.msk.f32.vlgmr.msrb.gmra.mxu1 %vm104_vm2, %v439_v54  ;;  %v568_v59 = vmul.f32 %v1000_v58, %v988_v37 }
 0x5a4   :  { %v359_v1 = vpop.f32.mrf.mxu1 }
 0x5a5   :  { %v441_v55 = vpop.permute.xlu1 %440  ;;  %v625_v10 = vpop.permute.xlu2 %624 }
 0x5a6   :  { %461 = vmatpush.msra.mxu3 %v441_v55  ;;  %v646_v12 = vsel %vm104_vm2, %v1199_v49, %v625_v10  ;;  %v964_v49 = vld [vmem:[%s1381_s5] ss:$0 sm:$0xff]  ;;  %v806_v10 = vld [vmem:[%s1386_s10 + $0x58] sm:$0xff] }
 0x5a7   :  { %934 = vmatmul.msk.f32.vlgmr.msra.gmra.mxu3 %vm104_vm2, %v438_v56 }
 0x5a9   :  { %v571_v57 = vpop.permute.xlu0 %570 }
 0x5aa   :  { %591 = vmatpush.msrb.mxu3 %v571_v57 }
 0x5af   :  { %940 = vmatmul.msk.f32.vlgmr.msrb.gmra.mxu3 %vm104_vm2, %v568_v59 }
 0x5b1   :  { %v597_v60 = vpop.permute.xlu0 %596 }
 0x5b2   :  { %617 = vmatpush.msra.mxu1 %v597_v60  ;;  %v965_v60 = vld [vmem:[%s1382_s6] ss:$0 sm:$0xff] }
 0x5d0   :  { %v565_v61 = vpop.xlane.xlu1 %564 }
 0x5d1   :  { %1001 = vrcp.f32 %v565_v61 }
 0x5d2   :  { %1003 = vrcp.f32 %v1053_v32  ;;  %v795_v32 = vld [vmem:[%s1386_s10] sm:$0xff] }
 0x5d7   :  { %v1002_v62 = vpop.eup %1001 }
 0x5d8   :  { %v569_v63 = vmul.f32 %v1002_v62, %v994_v46  ;;  %v1004_v33 = vpop.eup %1003 }
 0x5d9   :  { %v702_v34 = vmul.f32 32.0, %v1004_v33  ;;  %vm706_vm5 = vweird.f32 %v1004_v33 }
 0x5da   :  { %941 = vmatmul.msk.f32.vlgmr.msra.gmra.mxu1 %vm104_vm2, %v569_v63  ;;  %v966_v63 = vld [vmem:[%s1383_s7] ss:$0 sm:$0xff] }
 0x5db   :  { %v703_v35 = vsub.f32 1.0, %v702_v34 }
 0x5dd   :  { %v704_v36 = vmul.f32 %v1004_v33, %v703_v35 }
 0x5df   :  { %v705_v37 = vadd.f32 %v1004_v33, %v704_v36 }
 0x5e1   :  { %v1265_v38 = vsel %vm706_vm5, %v1004_v33, %v705_v37  ;;  %v967_v33 = vld [vmem:[%s1385_s9] ss:$0 sm:$0xff] }
 0x61d   :  { %v489_v3 = vpop.f32.mrf.mxu1 }
 0x62a   :  { %v463_v0 = vpop.f32.mrf.mxu3 }
 0x62b   :  { %632 = vrot.lane.b32.xlu0 %v463_v0, %s1051_s23 }
 0x632   :  { %v593_v2 = vpop.f32.mrf.mxu3 }
 0x633   :  { %626 = vrot.lane.b32.xlu0 %v359_v1, %s1050_s22  ;;  %640 = vrot.lane.b32.xlu2 %v593_v2, %s1052_s24  ;;  %v810_v2 = vld [vmem:[%s1386_s10 + $0x78] sm:$0xff] }
 0x634   :  { %815 = vmatpush.msra.mxu3 %v810_v2 }
 0x63b   :  { %634 = vrot.lane.b32.xlu2 %v489_v3, %s1051_s23  ;;  %v809_v3 = vld [vmem:[%s1386_s10 + $0x70] sm:$0xff] }
 0x63c   :  { %816 = vmatpush.msra.mxu3 %v809_v3  ;;  %v969_v3 = vld [vmem:[%s1388_s12] ss:$0 sm:$0xff]  ;;  %s1054_s12 = smov [#allocation2]  }
 0x657   :  { %v619_v4 = vpop.f32.mrf.mxu1 }
 0x658   :  { %642 = vrot.lane.b32.xlu0 %v619_v4, %s1052_s24  ;;  %v808_v4 = vld [vmem:[%s1386_s10 + $0x68] sm:$0xff] }
 0x659   :  { %817 = vmatpush.msra.mxu3 %v808_v4 }
 0x65b   :  { %818 = vmatpush.msra.mxu3 %v807_v8 }
 0x65d   :  { %819 = vmatpush.msra.mxu3 %v806_v10 }
 0x68d   :  { %v641_v15 = vpop.permute.xlu2 %640 }
 0x695   :  { %v635_v21 = vpop.permute.xlu2 %634 }
 0x69d   :  { %v633_v13 = vpop.permute.xlu0 %632 }
 0x69e   :  { %v649_v17 = vsel %vm648_vm3, %v646_v12, %v633_v13  ;;  %v805_v12 = vld [vmem:[%s1386_s10 + $0x50] sm:$0xff]  ;;  %v804_v13 = vld [vmem:[%s1386_s10 + $0x48] sm:$0xff] }
 0x69f   :  { %v652_v18 = vsel %vm651_vm4, %v649_v17, %v641_v15  ;;  %820 = vmatpush.msra.mxu3 %v805_v12  ;;  %v803_v15 = vld [vmem:[%s1386_s10 + $0x40] sm:$0xff] }
 0x6a0   :  { %942 = vmatmul.msk.f32.vlgmr.msrb.gmra.mxu2 %vm69_vm1, %v652_v18  ;;  %v802_v18 = vld [vmem:[%s1386_s10 + $0x38] sm:$0xff] }
 0x6a1   :  { %821 = vmatpush.msra.mxu3 %v804_v13 }
 0x6a3   :  { %822 = vmatpush.msra.mxu3 %v803_v15 }
 0x6a5   :  { %v627_v19 = vpop.permute.xlu0 %626  ;;  %823 = vmatpush.msra.mxu3 %v802_v18 }
 0x6a6   :  { %v647_v20 = vsel %vm104_vm2, %v1201_v50, %v627_v19 }
 0x6a7   :  { %v650_v23 = vsel %vm648_vm3, %v647_v20, %v635_v21  ;;  %v801_v20 = vld [vmem:[%s1386_s10 + $0x30] sm:$0xff] }
 0x6a8   :  { %824 = vmatpush.msra.mxu3 %v801_v20 }
 0x6ca   :  { %v643_v22 = vpop.permute.xlu0 %642 }
 0x6cb   :  { %v653_v24 = vsel %vm651_vm4, %v650_v23, %v643_v22  ;;  %v800_v22 = vld [vmem:[%s1386_s10 + $0x28] sm:$0xff] }
 0x6cc   :  { %943 = vmatmul.msk.f32.gmra.mxu2 %vm69_vm1, %v653_v24  ;;  %v799_v24 = vld [vmem:[%s1386_s10 + $0x20] sm:$0xff]  ;;  %825 = vmatpush.msra.mxu3 %v800_v22 }
 0x6ce   :  { %826 = vmatpush.msra.mxu3 %v799_v24 }
 0x723   :  { %v685_v25 = vpop.f32.mrf.mxu2 }
 0x724   :  { %v686_v26 = vadd.f32 %v964_v49, %v685_v25  ;;  %v798_v25 = vld [vmem:[%s1386_s10 + $0x18] sm:$0xff] }
 0x725   :  { %827 = vmatpush.msra.mxu3 %v798_v25 }
 0x726   :  { %v691_v27 = vadd.f32 %v686_v26, %v1149_v7 }
 0x728   :  { %v695_v28 = vsel %vm69_vm1, %v691_v27, 0.0 }
 0x729   :  { %696 = vadd.xlane.f32.xlu2 %v695_v28 }
 0x74f   :  { %v688_v29 = vpop.f32.mrf.mxu2 }
 0x750   :  { %v689_v30 = vadd.f32 %v964_v49, %v688_v29 }
 0x752   :  { %v692_v50 = vadd.f32 %v689_v30, %v1159_v11 }
 0x754   :  { %v698_v31 = vsel %vm69_vm1, %v692_v50, 0.0 }
 0x755   :  { %699 = vadd.xlane.f32.xlu0 %v698_v31  ;;  %v796_v31 = vld [vmem:[%s1386_s10 + $0x8] sm:$0xff] }
 0x79c   :  { %v697_v7 = vpop.xlane.xlu2 %696 }
 0x79d   :  { %v708_v39 = vmul.f32 %v1265_v38, %v697_v7 }
 0x79f   :  { %v710_v40 = vsub.f32 %v691_v27, %v708_v39 }
 0x7a1   :  { %v712_v41 = vmul.f32 %v710_v40, %v710_v40 }
 0x7a3   :  { %v714_v11 = vsel %vm69_vm1, %v712_v41, 0.0 }
 0x7a4   :  { %715 = vadd.xlane.f32.xlu1 %v714_v11 }
 0x7c8   :  { %v700_v42 = vpop.xlane.xlu0 %699 }
 0x7c9   :  { %v709_v43 = vmul.f32 %v1265_v38, %v700_v42 }
 0x7cb   :  { %v1270_v44 = vsub.f32 %v692_v50, %v709_v43  ;;  %v797_v50 = vld [vmem:[%s1386_s10 + $0x10] sm:$0xff] }
 0x7cc   :  { %828 = vmatpush.msra.mxu3 %v797_v50 }
 0x7cd   :  { %v713_v45 = vmul.f32 %v1270_v44, %v1270_v44 }
 0x7ce   :  { %829 = vmatpush.msra.mxu3 %v796_v31 }
 0x7cf   :  { %v717_v46 = vsel %vm69_vm1, %v713_v45, 0.0 }
 0x7d0   :  { %718 = vadd.xlane.f32.xlu1 %v717_v46  ;;  %830 = vmatpush.msra.mxu3 %v795_v32 }
 0x817   :  { %v716_v53 = vpop.xlane.xlu1 %715 }
 0x818   :  { %v720_v14 = vmul.f32 %v716_v53, %v1265_v38 }
 0x81a   :  { %v722_v54 = vadd.f32 1e-05, %v720_v14 }
 0x81c   :  { %1005 = vrsqrt.f32 %v722_v54  ;;  %vm730_vm7 = vweird.f32 %v722_v54 }
 0x822   :  { %v1006_v16 = vpop.eup %1005 }
 0x823   :  { %v725_v55 = vmul.f32 %v1006_v16, %v722_v54  ;;  %vm731_vm6 = vweird.f32 %v1006_v16 }
 0x824   :  { %vm732_vm8 = vmor %vm730_vm7, %vm731_vm6 }
 0x825   :  { %v726_v56 = vmul.f32 %v1006_v16, %v725_v55 }
 0x827   :  { %v727_v57 = vmul.f32 0.5, %v726_v56 }
 0x829   :  { %v728_v58 = vsub.f32 1.5, %v727_v57 }
 0x82b   :  { %v729_v59 = vmul.f32 %v1006_v16, %v728_v58 }
 0x82d   :  { %v733_v61 = vsel %vm732_vm8, %v1006_v16, %v729_v59 }
 0x82e   :  { %v744_v62 = vmul.f32 %v733_v61, %v710_v40  ;;  %v968_v40 = vld [vmem:[%s1387_s11] ss:$0 sm:$0xff] }
 0x830   :  { %v749_v0 = vmul.f32 %v965_v60, %v744_v62 }
 0x832   :  { %v1294_v1 = vadd.f32 %v966_v63, %v749_v0 }
 0x834   :  { %944 = vmatmul.msk.f32.vlgmr.msrb.gmra.mxu0 %vm69_vm1, %v1294_v1 }
 0x843   :  { %v719_v5 = vpop.xlane.xlu1 %718 }
 0x844   :  { %v721_v6 = vmul.f32 %v719_v5, %v1265_v38 }
 0x846   :  { %v723_v9 = vadd.f32 1e-05, %v721_v6  ;;  %v970_v6 = vld [vmem:[%s1389_s13] ss:$0 sm:$0xff]  ;;  %s902_s13 = sshll.u32 %s1054_s12, 4  ;;  %s903_s13 = int_to_ptr.vmem [resolvable:$true] %s902_s13 }
 0x848   :  { %1007 = vrsqrt.f32 %v723_v9  ;;  %vm740_vm10 = vweird.f32 %v723_v9 }
 0x84e   :  { %v1008_v17 = vpop.eup %1007 }
 0x84f   :  { %v735_v19 = vmul.f32 %v1008_v17, %v723_v9  ;;  %vm741_vm9 = vweird.f32 %v1008_v17 }
 0x850   :  { %vm742_vm11 = vmor %vm740_vm10, %vm741_vm9 }
 0x851   :  { %v736_v21 = vmul.f32 %v1008_v17, %v735_v19 }
 0x853   :  { %v737_v23 = vmul.f32 0.5, %v736_v21 }
 0x855   :  { %v738_v49 = vsub.f32 1.5, %v737_v23 }
 0x857   :  { %v739_v26 = vmul.f32 %v1008_v17, %v738_v49 }
 0x859   :  { %v743_v27 = vsel %vm742_vm11, %v1008_v17, %v739_v26 }
 0x85a   :  { %v745_v28 = vmul.f32 %v743_v27, %v1270_v44 }
 0x85c   :  { %v750_v29 = vmul.f32 %v965_v60, %v745_v28 }
 0x85e   :  { %v755_v30 = vadd.f32 %v966_v63, %v750_v29 }
 0x860   :  { %945 = vmatmul.msk.f32.gmra.mxu0 %vm69_vm1, %v755_v30 }
 0x8b1   :  { %v787_v34 = vpop.f32.mrf.mxu0 }
 0x8b2   :  { %v788_v35 = vadd.f32 %v967_v33, %v787_v34 }
 0x8b4   :  { %v793_v36 = vmax.f32 %v788_v35, 0.0 }
 0x8b6   :  { %831 = vmatmul.f32.vlgmr.msra.gmra.mxu3 %v793_v36 }
 0x8dd   :  { %v790_v37 = vpop.f32.mrf.mxu0 }
 0x8de   :  { %v791_v7 = vadd.f32 %v967_v33, %v790_v37 }
 0x8e0   :  { %v794_v39 = vmax.f32 %v791_v7, 0.0 }
 0x8e2   :  { %834 = vmatmul.f32.gmra.mxu3 %v794_v39 }
 0x939   :  { %v832_v41 = vpop.f32.mrf.mxu3 }
 0x93a   :  { %v833_v11 = vadd.f32 %v968_v40, %v832_v41 }
 0x93c   :  { %v838_v42 = vadd.f32 %v833_v11, %v1294_v1 }
 0x93e   :  { %v842_v43 = vsel %vm69_vm1, %v838_v42, 0.0 }
 0x93f   :  { %843 = vadd.xlane.f32.xlu1 %v842_v43 }
 0x965   :  { %v835_v44 = vpop.f32.mrf.mxu3 }
 0x966   :  { %v836_v45 = vadd.f32 %v968_v40, %v835_v44 }
 0x968   :  { %v839_v46 = vadd.f32 %v836_v45, %v755_v30 }
 0x96a   :  { %v845_v47 = vsel %vm69_vm1, %v839_v46, 0.0 }
 0x96b   :  { %846 = vadd.xlane.f32.xlu1 %v845_v47 }
 0x9b2   :  { %v844_v48 = vpop.xlane.xlu1 %843 }
 0x9b3   :  { %v848_v51 = vmul.f32 %v844_v48, %v1265_v38 }
 0x9b5   :  { %v850_v52 = vsub.f32 %v838_v42, %v848_v51 }
 0x9b7   :  { %v852_v53 = vmul.f32 %v850_v52, %v850_v52 }
 0x9b9   :  { %v854_v14 = vsel %vm69_vm1, %v852_v53, 0.0 }
 0x9ba   :  { %855 = vadd.xlane.f32.xlu1 %v854_v14 }
 0x9de   :  { %v847_v54 = vpop.xlane.xlu1 %846 }
 0x9df   :  { %v849_v16 = vmul.f32 %v847_v54, %v1265_v38 }
 0x9e1   :  { %v851_v55 = vsub.f32 %v839_v46, %v849_v16 }
 0x9e3   :  { %v853_v56 = vmul.f32 %v851_v55, %v851_v55 }
 0x9e5   :  { %v857_v57 = vsel %vm69_vm1, %v853_v56, 0.0 }
 0x9e6   :  { %858 = vadd.xlane.f32.xlu2 %v857_v57 }
 0xa2d   :  { %v856_v58 = vpop.xlane.xlu1 %855 }
 0xa2e   :  { %v860_v59 = vmul.f32 %v856_v58, %v1265_v38 }
 0xa30   :  { %v862_v60 = vadd.f32 1e-05, %v860_v59 }
 0xa32   :  { %1009 = vrsqrt.f32 %v862_v60  ;;  %vm870_vm13 = vweird.f32 %v862_v60 }
 0xa38   :  { %v1010_v61 = vpop.eup %1009 }
 0xa39   :  { %v865_v62 = vmul.f32 %v1010_v61, %v862_v60  ;;  %vm871_vm12 = vweird.f32 %v1010_v61 }
 0xa3a   :  { %vm872_vm14 = vmor %vm870_vm13, %vm871_vm12 }
 0xa3b   :  { %v866_v63 = vmul.f32 %v1010_v61, %v865_v62 }
 0xa3d   :  { %v867_v0 = vmul.f32 0.5, %v866_v63 }
 0xa3f   :  { %v868_v1 = vsub.f32 1.5, %v867_v0 }
 0xa41   :  { %v869_v2 = vmul.f32 %v1010_v61, %v868_v1 }
 0xa43   :  { %v873_v4 = vsel %vm872_vm14, %v1010_v61, %v869_v2 }
 0xa44   :  { %v884_v5 = vmul.f32 %v873_v4, %v850_v52 }
 0xa46   :  { %v889_v8 = vmul.f32 %v969_v3, %v884_v5 }
 0xa48   :  { %v894_v9 = vadd.f32 %v970_v6, %v889_v8 }
 0xa4a   :  { %896 = vst.msk [vmem:[#allocation2] sm:$0xff] %vm69_vm1, %v894_v9 }
 0xa59   :  { %v859_v10 = vpop.xlane.xlu2 %858 }
 0xa5a   :  { %v861_v12 = vmul.f32 %v859_v10, %v1265_v38 }
 0xa5c   :  { %v863_v13 = vadd.f32 1e-05, %v861_v12 }
 0xa5e   :  { %1011 = vrsqrt.f32 %v863_v13  ;;  %vm880_vm0 = vweird.f32 %v863_v13 }
 0xa64   :  { %v1012_v15 = vpop.eup %1011 }
 0xa65   :  { %v875_v17 = vmul.f32 %v1012_v15, %v863_v13  ;;  %vm881_vm15 = vweird.f32 %v1012_v15 }
 0xa66   :  { %vm882_vm2 = vmor %vm880_vm0, %vm881_vm15 }
 0xa67   :  { %v876_v18 = vmul.f32 %v1012_v15, %v875_v17 }
 0xa69   :  { %v877_v19 = vmul.f32 0.5, %v876_v18 }
 0xa6b   :  { %v878_v20 = vsub.f32 1.5, %v877_v19 }
 0xa6d   :  { %v879_v21 = vmul.f32 %v1012_v15, %v878_v20 }
 0xa6f   :  { %v883_v22 = vsel %vm882_vm2, %v1012_v15, %v879_v21 }
 0xa70   :  { %v885_v23 = vmul.f32 %v883_v22, %v851_v55 }
 0xa72   :  { %v890_v38 = vmul.f32 %v969_v3, %v885_v23 }
 0xa74   :  { %v895_v24 = vadd.f32 %v970_v6, %v890_v38 }
 0xa76   :  { %897 = vst.msk [vmem:[#allocation2 + $0x8] sm:$0xff] %vm69_vm1, %v895_v24 }
 0xa77   :  { %910 = dma.vmem_to_hbm [thread:$0]  %s903_s13, 256, %s905_s16, [#allocation3], %s1055_s17, %s1055_s17, %s1050_s22  }
 0xa78   :  { %1037 = dma.done.wait [#allocation3], 256  }
 0xa79   :  { %1038 = vsyncadd [#allocation3], 4294967040 }
 0xa7a   :  { %915 = vsyncpa [#allocation3], 1 }

</bundles_post_ra>
